<compile_context>
chip_gen: v7x
topology: tpu7x:2x2x1
jax: 0.10.0
libtpu: 0.0.40
codegen_flags: <defaults>
</compile_context>

<pallas_src>
import functools

import jax
import jax.numpy as jnp
from jax.experimental import pallas as pl
from jax.experimental.pallas import tpu as pltpu

HIDDEN = 128
LANE = 128
SUBLANE = 8


def actor_critic_kernel(
    x_ref,            # [TB, d_in]   f32   (cast to bf16 in-kernel)
    w1_ref, b1_ref,   # [d_in, 128]  bf16, [1, 128] f32
    w2_ref, b2_ref,   # [128, 128]   bf16, [1, 128] f32
    wh_ref, bh_ref,   # [128, H_pad] bf16 (fused actor|critic|zeros), [1, H_pad] f32
    probs_ref,        # [TB, H_pad]  bf16  (lanes [0, A) = softmax probs, rest 0)
    value_ref,        # [TB, 1]      f32   (critic value)
    *,
    num_actions,
):
    bf16 = jnp.bfloat16

    # trunk: Linear -> ReLU -> Linear -> ReLU (bf16 MXU, f32 accumulate)
    x = x_ref[...].astype(bf16)
    h1 = jnp.dot(x, w1_ref[...], preferred_element_type=jnp.float32)
    h1 = jnp.maximum(h1 + b1_ref[...], 0.0).astype(bf16)
    h2 = jnp.dot(h1, w2_ref[...], preferred_element_type=jnp.float32)
    h2 = jnp.maximum(h2 + b2_ref[...], 0.0).astype(bf16)

    # fused heads: one lane-dense matmul producing actor logits + critic value
    head = jnp.dot(h2, wh_ref[...], preferred_element_type=jnp.float32) + bh_ref[...]

    col = jax.lax.broadcasted_iota(jnp.int32, head.shape, 1)
    actor_mask = col < num_actions

    # masked softmax over the actor lanes only (fused where/exp to limit temps)
    m = jnp.max(jnp.where(actor_mask, head, -jnp.inf), axis=-1, keepdims=True)
    e = jnp.where(actor_mask, jnp.exp(head - m), 0.0)
    denom = jnp.sum(e, axis=-1, keepdims=True)
    probs_ref[...] = (e / denom).astype(probs_ref.dtype)   # bf16 lane-dense store

    # critic value: lane `num_actions` of head, extracted via XLU lane-reduce,
    # stored in f32 so critic precision is preserved.
    value_ref[...] = jnp.sum(
        jnp.where(col == num_actions, head, 0.0), axis=-1, keepdims=True
    )


def _round_up(n, m):
    return ((n + m - 1) // m) * m


def actor_critic_forward(x, params, *, block_rows=None):
    """x: [B, num_inputs] float32. params: dict from init_params.
    Returns (action_probs [B, A] f32, state_values [B, 1] f32)."""
    B, d_in = x.shape
    A = params["wa"].shape[1]

    h_pad = _round_up(max(A + 1, LANE), LANE)   # fused head width (probs + value lane)

    # Batch tile: multiple of 8 sublanes, capped at 2048 rows (fits well under
    # v7x's 64 MiB VMEM with the explicit vmem_limit below), and sized so the
    # grid has >=2 steps when B permits (v7x megacore).
    if block_rows is None:
        tb = min(2048, max(SUBLANE, _round_up(pl.cdiv(B, 2), SUBLANE)))
    else:
        tb = _round_up(block_rows, SUBLANE)
    tb = min(tb, _round_up(B, SUBLANE))
    grid = (pl.cdiv(B, tb),)                    # partial last block handled by Pallas

    f32 = jnp.float32
    bf16 = jnp.bfloat16

    # trunk weights (bf16 for MXU; biases stay f32)
    w1 = params["w1"].astype(bf16)              # [d_in, 128] — no feature padding
    b1 = params["b1"].astype(f32)
    w2 = params["w2"].astype(bf16)
    b2 = params["b2"].astype(f32)

    # fused head weights: [wa | wc | 0-pad] -> [128, h_pad]
    wh = jnp.zeros((HIDDEN, h_pad), bf16)
    wh = wh.at[:, :A].set(params["wa"].astype(bf16))
    wh = wh.at[:, A:A + 1].set(params["wc"].astype(bf16))
    bh = jnp.zeros((1, h_pad), f32)
    bh = bh.at[:, :A].set(params["ba"].astype(f32))
    bh = bh.at[:, A:A + 1].set(params["bc"].astype(f32))

    kernel = functools.partial(actor_critic_kernel, num_actions=A)

    probs_slab, values = pl.pallas_call(
        kernel,
        out_shape=(
            jax.ShapeDtypeStruct((B, h_pad), bf16),   # actor probs slab (bf16)
            jax.ShapeDtypeStruct((B, 1), f32),        # critic values (f32)
        ),
        grid=grid,
        in_specs=[
            pl.BlockSpec((tb, d_in), lambda i: (i, 0)),        # x: tiled over batch
            pl.BlockSpec((d_in, HIDDEN), lambda i: (0, 0)),    # weights stay resident
            pl.BlockSpec((1, HIDDEN), lambda i: (0, 0)),
            pl.BlockSpec((HIDDEN, HIDDEN), lambda i: (0, 0)),
            pl.BlockSpec((1, HIDDEN), lambda i: (0, 0)),
            pl.BlockSpec((HIDDEN, h_pad), lambda i: (0, 0)),
            pl.BlockSpec((1, h_pad), lambda i: (0, 0)),
        ],
        out_specs=(
            pl.BlockSpec((tb, h_pad), lambda i: (i, 0)),
            pl.BlockSpec((tb, 1), lambda i: (i, 0)),
        ),
        compiler_params=pltpu.CompilerParams(
            dimension_semantics=("parallel",),          # shard batch over TCs (v7x)
            vmem_limit_bytes=40 * 1024 * 1024,          # allow large batch tiles
        ),
    )(x, w1, b1, w2, b2, wh, bh)

    probs = probs_slab[:, :A].astype(f32)   # tiny slice/cast; stays inside caller's jit
    return probs, values


def init_params(key, num_inputs, num_actions, hidden=HIDDEN):
    """Deterministic init mimicking nn.Linear default: U(-1/sqrt(fan_in), 1/sqrt(fan_in)).
    Weights stored as [in, out]."""
    def linear(k, fan_in, fan_out):
        kw, kb = jax.random.split(k)
        bound = 1.0 / jnp.sqrt(fan_in)
        w = jax.random.uniform(kw, (fan_in, fan_out), jnp.float32, -bound, bound)
        b = jax.random.uniform(kb, (1, fan_out), jnp.float32, -bound, bound)
        return w, b

    k1, k2, k3, k4 = jax.random.split(key, 4)
    w1, b1 = linear(k1, num_inputs, hidden)
    w2, b2 = linear(k2, hidden, hidden)
    wa, ba = linear(k3, hidden, num_actions)
    wc, bc = linear(k4, hidden, 1)
    return dict(w1=w1, b1=b1, w2=w2, b2=b2, wa=wa, ba=ba, wc=wc, bc=bc)


def _reference(x, p):
    h = jnp.maximum(x @ p["w1"] + p["b1"], 0.0)
    h = jnp.maximum(h @ p["w2"] + p["b2"], 0.0)
    probs = jax.nn.softmax(h @ p["wa"] + p["ba"], axis=-1)
    values = h @ p["wc"] + p["bc"]
    return probs, values


if __name__ == "__main__":
    key = jax.random.PRNGKey(0)
    kx, kp = jax.random.split(key)

    B, NUM_INPUTS, NUM_ACTIONS = 8, 32, 8
    x = jax.random.normal(kx, (B, NUM_INPUTS), jnp.float32)
    params = init_params(kp, NUM_INPUTS, NUM_ACTIONS)

    fwd = jax.jit(actor_critic_forward)
    probs, values = fwd(x, params)
    jax.block_until_ready((probs, values))

    # sanity check against plain-JAX f32 reference (bf16 MXU + bf16 probs slab
    # => loosened tolerances)
    ref_probs, ref_values = _reference(x, params)
    assert probs.shape == (B, NUM_ACTIONS) and values.shape == (B, 1)
    assert jnp.allclose(probs, ref_probs, atol=3e-2, rtol=3e-2), (
        f"probs mismatch: max abs err {jnp.max(jnp.abs(probs - ref_probs))}")
    assert jnp.allclose(values, ref_values, atol=3e-2, rtol=3e-2), (
        f"values mismatch: max abs err {jnp.max(jnp.abs(values - ref_values))}")
    assert jnp.allclose(jnp.sum(probs, axis=-1), 1.0, atol=1e-2)

    print("KERNEL_OK")
</pallas_src>

<mosaic_0001>
module attributes {stable_mosaic.version = 11 : i64} {
  func.func @actor_critic_kernel(%arg0: i32, %arg1: memref<8x32xf32, #tpu.memory_space<vmem>>, %arg2: memref<32x128xbf16, #tpu.memory_space<vmem>>, %arg3: memref<1x128xf32, #tpu.memory_space<vmem>>, %arg4: memref<128x128xbf16, #tpu.memory_space<vmem>>, %arg5: memref<1x128xf32, #tpu.memory_space<vmem>>, %arg6: memref<128x128xbf16, #tpu.memory_space<vmem>>, %arg7: memref<1x128xf32, #tpu.memory_space<vmem>>, %arg8: memref<8x128xbf16, #tpu.memory_space<vmem>>, %arg9: memref<8x1xf32, #tpu.memory_space<vmem>>) attributes {dimension_semantics = [#tpu.dimension_semantics<parallel>], iteration_bounds = array<i64: 1>, scalar_prefetch = 0 : i64, scratch_operands = 0 : i64, tpu.core_type = #tpu.core_type<tc>, window_params = [{transform_indices = @transform_0, window_bounds = array<i64: 8, 32>}, {pipeline_mode = #tpu.pipeline_mode<synchronous>, transform_indices = @transform_1, window_bounds = array<i64: 32, 128>}, {pipeline_mode = #tpu.pipeline_mode<synchronous>, transform_indices = @transform_2, window_bounds = array<i64: 1, 128>}, {pipeline_mode = #tpu.pipeline_mode<synchronous>, transform_indices = @transform_3, window_bounds = array<i64: 128, 128>}, {pipeline_mode = #tpu.pipeline_mode<synchronous>, transform_indices = @transform_4, window_bounds = array<i64: 1, 128>}, {pipeline_mode = #tpu.pipeline_mode<synchronous>, transform_indices = @transform_5, window_bounds = array<i64: 128, 128>}, {pipeline_mode = #tpu.pipeline_mode<synchronous>, transform_indices = @transform_6, window_bounds = array<i64: 1, 128>}, {transform_indices = @transform_7, window_bounds = array<i64: 8, 128>}, {transform_indices = @transform_8, window_bounds = array<i64: 8, 1>}]} {
    %c0 = arith.constant 0 : index
    %c0_0 = arith.constant 0 : index
    %0 = vector.load %arg1[%c0, %c0_0] : memref<8x32xf32, #tpu.memory_space<vmem>>, vector<8x32xf32>
    %1 = arith.truncf %0 : vector<8x32xf32> to vector<8x32xbf16>
    %c0_1 = arith.constant 0 : index
    %c0_2 = arith.constant 0 : index
    %2 = vector.load %arg2[%c0_1, %c0_2] : memref<32x128xbf16, #tpu.memory_space<vmem>>, vector<32x128xbf16>
    %cst = arith.constant dense<0.000000e+00> : vector<8x128xf32>
    %3 = tpu.matmul %1, %2, %cst {dimension_numbers = #tpu.dot_dimension_numbers<[1], [0], [0], [1], [0, 0, 1, 1], [], []>} : vector<8x32xbf16>, vector<32x128xbf16>, vector<8x128xf32> -> vector<8x128xf32>
    %c0_3 = arith.constant 0 : index
    %c0_4 = arith.constant 0 : index
    %4 = vector.load %arg3[%c0_3, %c0_4] : memref<1x128xf32, #tpu.memory_space<vmem>>, vector<1x128xf32>
    %5 = vector.broadcast %4 : vector<1x128xf32> to vector<8x128xf32>
    %6 = arith.addf %3, %5 : vector<8x128xf32>
    %cst_5 = arith.constant 0.000000e+00 : f32
    %7 = vector.broadcast %cst_5 : f32 to vector<8x128xf32>
    %8 = arith.maximumf %6, %7 : vector<8x128xf32>
    %9 = arith.truncf %8 : vector<8x128xf32> to vector<8x128xbf16>
    %c0_6 = arith.constant 0 : index
    %c0_7 = arith.constant 0 : index
    %10 = vector.load %arg4[%c0_6, %c0_7] : memref<128x128xbf16, #tpu.memory_space<vmem>>, vector<128x128xbf16>
    %cst_8 = arith.constant dense<0.000000e+00> : vector<8x128xf32>
    %11 = tpu.matmul %9, %10, %cst_8 {dimension_numbers = #tpu.dot_dimension_numbers<[1], [0], [0], [1], [0, 0, 1, 1], [], []>} : vector<8x128xbf16>, vector<128x128xbf16>, vector<8x128xf32> -> vector<8x128xf32>
    %c0_9 = arith.constant 0 : index
    %c0_10 = arith.constant 0 : index
    %12 = vector.load %arg5[%c0_9, %c0_10] : memref<1x128xf32, #tpu.memory_space<vmem>>, vector<1x128xf32>
    %13 = vector.broadcast %12 : vector<1x128xf32> to vector<8x128xf32>
    %14 = arith.addf %11, %13 : vector<8x128xf32>
    %cst_11 = arith.constant 0.000000e+00 : f32
    %15 = vector.broadcast %cst_11 : f32 to vector<8x128xf32>
    %16 = arith.maximumf %14, %15 : vector<8x128xf32>
    %17 = arith.truncf %16 : vector<8x128xf32> to vector<8x128xbf16>
    %c0_12 = arith.constant 0 : index
    %c0_13 = arith.constant 0 : index
    %18 = vector.load %arg6[%c0_12, %c0_13] : memref<128x128xbf16, #tpu.memory_space<vmem>>, vector<128x128xbf16>
    %cst_14 = arith.constant dense<0.000000e+00> : vector<8x128xf32>
    %19 = tpu.matmul %17, %18, %cst_14 {dimension_numbers = #tpu.dot_dimension_numbers<[1], [0], [0], [1], [0, 0, 1, 1], [], []>} : vector<8x128xbf16>, vector<128x128xbf16>, vector<8x128xf32> -> vector<8x128xf32>
    %c0_15 = arith.constant 0 : index
    %c0_16 = arith.constant 0 : index
    %20 = vector.load %arg7[%c0_15, %c0_16] : memref<1x128xf32, #tpu.memory_space<vmem>>, vector<1x128xf32>
    %21 = vector.broadcast %20 : vector<1x128xf32> to vector<8x128xf32>
    %22 = arith.addf %19, %21 : vector<8x128xf32>
    %23 = tpu.iota {dimensions = array<i32: 1>} : vector<8x128xi32>
    %c8_i32 = arith.constant 8 : i32
    %24 = vector.broadcast %c8_i32 : i32 to vector<8x128xi32>
    %25 = arith.cmpi slt, %23, %24 : vector<8x128xi32>
    %cst_17 = arith.constant 0xFF800000 : f32
    %26 = vector.broadcast %cst_17 : f32 to vector<8x128xf32>
    %27 = arith.select %25, %22, %26 : vector<8x128xi1>, vector<8x128xf32>
    %cst_18 = arith.constant dense<0xFF800000> : vector<8xf32>
    %28 = vector.multi_reduction <maximumf>, %27, %cst_18 [1] : vector<8x128xf32> to vector<8xf32>
    %29 = vector.shape_cast %28 : vector<8xf32> to vector<8x1xf32>
    %30 = vector.broadcast %29 : vector<8x1xf32> to vector<8x128xf32>
    %31 = arith.subf %22, %30 : vector<8x128xf32>
    %32 = math.exp %31 : vector<8x128xf32>
    %cst_19 = arith.constant 0.000000e+00 : f32
    %33 = vector.broadcast %cst_19 : f32 to vector<8x128xf32>
    %34 = arith.select %25, %32, %33 : vector<8x128xi1>, vector<8x128xf32>
    %cst_20 = arith.constant dense<0.000000e+00> : vector<8xf32>
    %35 = vector.multi_reduction <add>, %34, %cst_20 [1] : vector<8x128xf32> to vector<8xf32>
    %36 = vector.shape_cast %35 : vector<8xf32> to vector<8x1xf32>
    %37 = vector.broadcast %36 : vector<8x1xf32> to vector<8x128xf32>
    %38 = arith.divf %34, %37 : vector<8x128xf32>
    %39 = arith.truncf %38 : vector<8x128xf32> to vector<8x128xbf16>
    %c0_21 = arith.constant 0 : index
    %c0_22 = arith.constant 0 : index
    %40 = vector.load %arg8[%c0_21, %c0_22] : memref<8x128xbf16, #tpu.memory_space<vmem>>, vector<8x128xbf16>
    tpu.vector_store %arg8[%c0_21, %c0_22], %39 {strides = array<i32>} : memref<8x128xbf16, #tpu.memory_space<vmem>>, vector<8x128xbf16>,
    %c8_i32_23 = arith.constant 8 : i32
    %41 = vector.broadcast %c8_i32_23 : i32 to vector<8x128xi32>
    %42 = arith.cmpi eq, %23, %41 : vector<8x128xi32>
    %cst_24 = arith.constant 0.000000e+00 : f32
    %43 = vector.broadcast %cst_24 : f32 to vector<8x128xf32>
    %44 = arith.select %42, %22, %43 : vector<8x128xi1>, vector<8x128xf32>
    %cst_25 = arith.constant dense<0.000000e+00> : vector<8xf32>
    %45 = vector.multi_reduction <add>, %44, %cst_25 [1] : vector<8x128xf32> to vector<8xf32>
    %46 = vector.shape_cast %45 : vector<8xf32> to vector<8x1xf32>
    %c0_26 = arith.constant 0 : index
    %c0_27 = arith.constant 0 : index
    %47 = vector.load %arg9[%c0_26, %c0_27] : memref<8x1xf32, #tpu.memory_space<vmem>>, vector<8x1xf32>
    tpu.vector_store %arg9[%c0_26, %c0_27], %46 {strides = array<i32>} : memref<8x1xf32, #tpu.memory_space<vmem>>, vector<8x1xf32>,
    return
  }
  func.func @transform_0(%arg0: i32) -> (i32, i32) {
    %c0_i32 = arith.constant 0 : i32
    %c0_i32_0 = arith.constant 0 : i32
    return %arg0, %c0_i32 : i32, i32
  }
  func.func @transform_1(%arg0: i32) -> (i32, i32) {
    %c0_i32 = arith.constant 0 : i32
    %c0_i32_0 = arith.constant 0 : i32
    %c0_i32_1 = arith.constant 0 : i32
    return %c0_i32, %c0_i32_0 : i32, i32
  }
  func.func @transform_2(%arg0: i32) -> (i32, i32) {
    %c0_i32 = arith.constant 0 : i32
    %c0_i32_0 = arith.constant 0 : i32
    %c0_i32_1 = arith.constant 0 : i32
    return %c0_i32, %c0_i32_0 : i32, i32
  }
  func.func @transform_3(%arg0: i32) -> (i32, i32) {
    %c0_i32 = arith.constant 0 : i32
    %c0_i32_0 = arith.constant 0 : i32
    %c0_i32_1 = arith.constant 0 : i32
    return %c0_i32, %c0_i32_0 : i32, i32
  }
  func.func @transform_4(%arg0: i32) -> (i32, i32) {
    %c0_i32 = arith.constant 0 : i32
    %c0_i32_0 = arith.constant 0 : i32
    %c0_i32_1 = arith.constant 0 : i32
    return %c0_i32, %c0_i32_0 : i32, i32
  }
  func.func @transform_5(%arg0: i32) -> (i32, i32) {
    %c0_i32 = arith.constant 0 : i32
    %c0_i32_0 = arith.constant 0 : i32
    %c0_i32_1 = arith.constant 0 : i32
    return %c0_i32, %c0_i32_0 : i32, i32
  }
  func.func @transform_6(%arg0: i32) -> (i32, i32) {
    %c0_i32 = arith.constant 0 : i32
    %c0_i32_0 = arith.constant 0 : i32
    %c0_i32_1 = arith.constant 0 : i32
    return %c0_i32, %c0_i32_0 : i32, i32
  }
  func.func @transform_7(%arg0: i32) -> (i32, i32) {
    %c0_i32 = arith.constant 0 : i32
    %c0_i32_0 = arith.constant 0 : i32
    return %arg0, %c0_i32 : i32, i32
  }
  func.func @transform_8(%arg0: i32) -> (i32, i32) {
    %c0_i32 = arith.constant 0 : i32
    %c0_i32_0 = arith.constant 0 : i32
    return %arg0, %c0_i32 : i32, i32
  }
}

</mosaic_0001>

<bundles_post_ra>
// kernel: actor_critic_forward.1
= control target key start
LH: loop header
LB: loop body
LE: loop exit
PB: predicated region body
PF: predicated region fallthrough
CT: control target
= control target key end

     0   :  { %v469_v0 = vmov 0.0   ;;  %vm470_vm0 = vmmov 0   ;;  %vm54_vm1 = vcmask 261120   ;;  %v324_v37 = vlaneseq  ;;  %s614_s1 = inlined_call_operand.vmem [shape: bf16[32,128], index: 1, kind: input, shape index: {}]   ;;  %s615_s0 = inlined_call_operand.vmem [shape: f32[8,32], index: 0, kind: input, shape index: {}]   ;;  %s616_s3 = inlined_call_operand.vmem [shape: bf16[128,128], index: 3, kind: input, shape index: {}]   ;;  %s617_s5 = inlined_call_operand.vmem [shape: bf16[128,128], index: 5, kind: input, shape index: {}]   ;;  %s618_s2 = inlined_call_operand.vmem [shape: f32[1,128], index: 2, kind: input, shape index: {}]   ;;  %s619_s4 = inlined_call_operand.vmem [shape: f32[1,128], index: 4, kind: input, shape index: {}]   ;;  %s620_s6 = inlined_call_operand.vmem [shape: f32[1,128], index: 6, kind: input, shape index: {}]   ;;  %s621_s8 = inlined_call_operand.vmem [shape: f32[8,1], index: 8, kind: output, shape index: {1}]   ;;  %s622_s7 = inlined_call_operand.vmem [shape: bf16[8,128], index: 7, kind: output, shape index: {0}]  }
   0x1   :  { %397 = vmatprep.subr.bf16.mxu0 %v469_v0  ;;  %v447_v1 = vld [vmem:[%s614_s1] sm:$0xff]   ;;  %401 = vmatprep.mubr.msk.bf16.mxu0 %vm470_vm0, %v469_v0  ;;  %v448_v2 = vld [vmem:[%s614_s1 + $0x8] sm:$0xff]   ;;  %v451_v7 = vld [vmem:[%s616_s3 + $0x10] sm:$0xff]   ;;  %vm344_vm4 = vcmask 7168  }
   0x2   :  { %405 = vmatprep.subr.bf16.mxu1 %v469_v0  ;;  %421 = vmatprep.mubr.msk.bf16.mxu1 %vm470_vm0, %v469_v0  ;;  %v29_v3 = vld [vmem:[%s615_s0] sm:$0xff]  ;;  %v450_v6 = vld [vmem:[%s616_s3 + $0x8] sm:$0xff]   ;;  %v452_v8 = vld [vmem:[%s616_s3 + $0x18] sm:$0xff]   ;;  %v325_v38 = vand.u32 127, %v324_v37 }
   0x3   :  { %398 = vmatpush3.bf16.msra.mxu0 %v447_v1  ;;  %v449_v4 = vld [vmem:[%s616_s3] sm:$0xff]   ;;  %v30_v5 = vpack.c.bf16 %v29_v3, %v29_v3  ;;  %v454_v10 = vld [vmem:[%s616_s3 + $0x28] sm:$0xff]   ;;  %v455_v11 = vld [vmem:[%s616_s3 + $0x30] sm:$0xff]  }
   0x4   :  { %399 = vmatprep.subr.bf16.mxu0 %v469_v0  ;;  %406 = vmatpush3.bf16.msra.mxu1 %v449_v4  ;;  %v453_v9 = vld [vmem:[%s616_s3 + $0x20] sm:$0xff]   ;;  %v456_v12 = vld [vmem:[%s616_s3 + $0x38] sm:$0xff]   ;;  %v458_v14 = vld [vmem:[%s617_s5 + $0x8] sm:$0xff]   ;;  %vm340_vm2 = vcmp.eq.s32.totalorder %v325_v38, 8  ;;  %vm326_vm3 = vcmp.lt.s32.totalorder %v325_v38, 8 }
   0x5   :  { %407 = vmatprep.subr.bf16.mxu1 %v469_v0  ;;  %v457_v13 = vld [vmem:[%s617_s5] sm:$0xff]   ;;  %v459_v15 = vld [vmem:[%s617_s5 + $0x10] sm:$0xff]   ;;  %v460_v16 = vld [vmem:[%s617_s5 + $0x18] sm:$0xff]  }
   0x6   :  { %v461_v17 = vld [vmem:[%s617_s5 + $0x20] sm:$0xff]   ;;  %v462_v18 = vld [vmem:[%s617_s5 + $0x28] sm:$0xff]   ;;  %v463_v27 = vld [vmem:[%s617_s5 + $0x30] sm:$0xff]  }
   0x7   :  { %400 = vmatpush3.bf16.msra.mxu0 %v448_v2  ;;  %v354_v19 = vld [vmem:[%s618_s2] ss:$0 sm:$0xff]  ;;  %v464_v28 = vld [vmem:[%s617_s5 + $0x38] sm:$0xff]  }
   0x8   :  { %425 = vmatprep.subr.bf16.mxu0 %v469_v0  ;;  %408 = vmatpush3.bf16.msra.mxu1 %v450_v6  ;;  %v358_v29 = vld [vmem:[%s619_s4] ss:$0 sm:$0xff] }
   0x9   :  { %409 = vmatprep.subr.bf16.mxu1 %v469_v0  ;;  %v367_v39 = vld [vmem:[%s620_s6] ss:$0 sm:$0xff] }
   0xa   :  { %402 = vmatmul.mubr.msk.bf16.vlgmr.msra.gmra.mrb[0].mxu0 %vm54_vm1, %v30_v5 }
   0xb   :  { %441 = vmatprep.mubr.msk.bf16.mxu0 %vm470_vm0, %v469_v0  ;;  %426 = vmatpush3.bf16.msra.mxu0 %v457_v13 }
   0xc   :  { %410 = vmatpush3.bf16.msra.mxu1 %v451_v7  ;;  %427 = vmatprep.subr.bf16.mxu0 %v469_v0 }
   0xd   :  { %411 = vmatprep.subr.bf16.mxu1 %v469_v0 }
   0xf   :  { %428 = vmatpush3.bf16.msra.mxu0 %v458_v14 }
  0x10   :  { %412 = vmatpush3.bf16.msra.mxu1 %v452_v8  ;;  %429 = vmatprep.subr.bf16.mxu0 %v469_v0 }
  0x11   :  { %413 = vmatprep.subr.bf16.mxu1 %v469_v0 }
  0x13   :  { %430 = vmatpush3.bf16.msra.mxu0 %v459_v15 }
  0x14   :  { %414 = vmatpush3.bf16.msra.mxu1 %v453_v9  ;;  %431 = vmatprep.subr.bf16.mxu0 %v469_v0 }
  0x15   :  { %415 = vmatprep.subr.bf16.mxu1 %v469_v0 }
  0x17   :  { %432 = vmatpush3.bf16.msra.mxu0 %v460_v16 }
  0x18   :  { %416 = vmatpush3.bf16.msra.mxu1 %v454_v10  ;;  %433 = vmatprep.subr.bf16.mxu0 %v469_v0 }
  0x19   :  { %417 = vmatprep.subr.bf16.mxu1 %v469_v0 }
  0x1b   :  { %434 = vmatpush3.bf16.msra.mxu0 %v461_v17 }
  0x1c   :  { %418 = vmatpush3.bf16.msra.mxu1 %v455_v11  ;;  %435 = vmatprep.subr.bf16.mxu0 %v469_v0 }
  0x1d   :  { %419 = vmatprep.subr.bf16.mxu1 %v469_v0 }
  0x1f   :  { %436 = vmatpush3.bf16.msra.mxu0 %v462_v18 }
  0x20   :  { %420 = vmatpush3.bf16.msra.mxu1 %v456_v12  ;;  %437 = vmatprep.subr.bf16.mxu0 %v469_v0 }
  0x23   :  { %438 = vmatpush3.bf16.msra.mxu0 %v463_v27 }
  0x24   :  { %439 = vmatprep.subr.bf16.mxu0 %v469_v0 }
  0x27   :  { %440 = vmatpush3.bf16.msra.mxu0 %v464_v28 }
  0xdd   :  { %v92_v20 = vpop.f32.mrb[0].mxu0 }
  0xde   :  { %v93_v21 = vadd.f32 %v354_v19, %v92_v20  ;;  %v403_v22 = vpop.f32.mrb[1].mxu0 }
  0xdf   :  { %v95_v23 = vpop.f32.mrb[2].mxu0 }
  0xe0   :  { %v98_v24 = vmax.f32 %v93_v21, 0.0  ;;  %v404_v25 = vpop.f32.mrb[3].mxu0 }
  0xe2   :  { %v99_v26 = vpack.c.bf16 %v98_v24, %v98_v24 }
  0xe4   :  { %422 = vmatmul.mubr.bf16.vlgmr.msra.gmra.mrb[0].mxu1 %v99_v26 }
 0x1b7   :  { %v205_v30 = vpop.f32.mrb[0].mxu1 }
 0x1b8   :  { %v206_v31 = vadd.f32 %v358_v29, %v205_v30  ;;  %v423_v32 = vpop.f32.mrb[1].mxu1 }
 0x1b9   :  { %v208_v33 = vpop.f32.mrb[2].mxu1 }
 0x1ba   :  { %v211_v34 = vmax.f32 %v206_v31, 0.0  ;;  %v424_v35 = vpop.f32.mrb[3].mxu1 }
 0x1bc   :  { %v212_v36 = vpack.c.bf16 %v211_v34, %v211_v34 }
 0x1be   :  { %442 = vmatmul.mubr.bf16.vlgmr.msra.gmra.mrb[4].mxu0 %v212_v36 }
 0x291   :  { %v318_v40 = vpop.f32.mrb[4].mxu0 }
 0x292   :  { %v319_v41 = vadd.f32 %v367_v39, %v318_v40  ;;  %v443_v42 = vpop.f32.mrb[5].mxu0 }
 0x293   :  { %v321_v43 = vpop.f32.mrb[6].mxu0 }
 0x294   :  { %v444_v44 = vpop.f32.mrb[7].mxu0  ;;  %v341_v45 = vsel %vm340_vm2, %v319_v41, 0.0  ;;  %v327_v46 = vsel %vm326_vm3, %v319_v41, -inf }
 0x295   :  { %342 = vadd.xlane.f32.xlu1 %v341_v45  ;;  %328 = vmax.xlane.f32.xlu0 %v327_v46 }
 0x322   :  { %v343_v47 = vpop.xlane.xlu1 %342  ;;  %v329_v48 = vpop.xlane.xlu0 %328 }
 0x323   :  { %345 = vst.msk [vmem:[%s621_s8] sm:$0xff] %vm344_vm4, %v343_v47  ;;  %v330_v49 = vsub.f32 %v319_v41, %v329_v48 }
 0x325   :  { %v331_v50 = vmul.f32 1.442695, %v330_v49 }
 0x327   :  { %465 = vpow2.f32 %v331_v50 }
 0x331   :  { %v466_v51 = vpop.eup %465 }
 0x332   :  { %v333_v52 = vsel %vm326_vm3, %v466_v51, 0.0 }
 0x333   :  { %334 = vadd.xlane.f32.xlu0 %v333_v52 }
 0x3c0   :  { %v335_v53 = vpop.xlane.xlu0 %334 }
 0x3c1   :  { %467 = vrcp.f32 %v335_v53 }
 0x3cb   :  { %v468_v54 = vpop.eup %467 }
 0x3cc   :  { %v337_v55 = vmul.f32 %v468_v54, %v333_v52 }
 0x3ce   :  { %v338_v56 = vpack.c.bf16 %v337_v55, %v337_v55 }
 0x3d0   :  { %339 = vst [vmem:[%s622_s7] sm:$0xf] %v338_v56 }

</bundles_post_ra>
